<compile_context>
chip_gen: v7x
topology: tpu7x:2x2x1
jax: 0.10.0
libtpu: 0.0.40
codegen_flags: <defaults>
</compile_context>

<pallas_src>
import functools
import math

import jax
import jax.numpy as jnp
import numpy as np
from jax.experimental import pallas as pl
from jax.experimental.pallas import tpu as pltpu


def _round_up(x, m):
    return ((x + m - 1) // m) * m


def _hw_config():
    """Generation-dependent tiles / scoped-VMEM budget.

    v5e/v6e have 128 MiB VMEM (big tiles, generous limit); v7x has 64 MiB per
    TensorCore (keep tiles and limit capped)."""
    vmem_bytes = None
    try:
        vmem_bytes = int(pltpu.get_tpu_info().vmem_capacity_bytes)
    except Exception:
        vmem_bytes = None
    if vmem_bytes is not None and vmem_bytes > 96 * 1024 * 1024:
        return {"vmem_limit": 80 * 1024 * 1024, "mm_tm": 512, "mm_tn": 512,
                "g_tm": 256}
    return {"vmem_limit": 44 * 1024 * 1024, "mm_tm": 256, "mm_tn": 512,
            "g_tm": 128}


_CFG = _hw_config()
_BN_EPS = 1e-5
_PACK_LANES = 128   # grouped convs are packed block-diagonally to 128 lanes


def _choose_m_tiling(m, cap):
    """Pick (tm, padded_m).  Prefer divisors of m so no pad/un-pad HBM pass."""
    if m <= cap:
        mp = _round_up(m, 16)
        return mp, mp
    for t in (cap, 512, 256, 128, 64, 32, 16):
        if t <= cap and m % t == 0:
            return t, m
    return cap, _round_up(m, cap)


def _pick_tn(n, cap):
    if n <= cap:
        return n
    for t in (cap, 256, 128):
        if n % t == 0:
            return t
    return n


# ----------------------------------------------------------------------------
# Pallas kernels
# ----------------------------------------------------------------------------
def _mm_bn_kernel(a_ref, b_ref, sc_ref, sh_ref, *rest, apply_relu, has_residual):
    """(tm, K)bf16 @ (K, tn)bf16 -> f32 accumulation with fused BN scale/shift,
    optional residual add and optional ReLU; bf16 lane-dense store."""
    if has_residual:
        r_ref, o_ref = rest
    else:
        (o_ref,) = rest
    y = jnp.dot(a_ref[...], b_ref[...], preferred_element_type=jnp.float32)
    y = y * sc_ref[...] + sh_ref[...]
    if has_residual:
        y = y + r_ref[...].astype(jnp.float32)
    if apply_relu:
        y = jnp.maximum(y, 0.0)
    o_ref[...] = y.astype(o_ref.dtype)


def matmul_bn(a, b, scale, shift, *, relu, residual=None):
    """a: (M, K) bf16, b: (K, N) bf16, scale/shift: (1, N) f32,
    residual: (M, N) bf16 or None  ->  (M, N) bf16."""
    m, k = a.shape
    n = b.shape[1]
    tm, mp = _choose_m_tiling(m, _CFG["mm_tm"])
    tn = _pick_tn(n, _CFG["mm_tn"])
    if mp != m:
        a = jnp.pad(a, ((0, mp - m), (0, 0)))
        if residual is not None:
            residual = jnp.pad(residual, ((0, mp - m), (0, 0)))
    in_specs = [
        pl.BlockSpec((tm, k), lambda i, j: (i, 0)),    # full-dim K, no zero pad
        pl.BlockSpec((k, tn), lambda i, j: (0, j)),
        pl.BlockSpec((1, tn), lambda i, j: (0, j)),
        pl.BlockSpec((1, tn), lambda i, j: (0, j)),
    ]
    args = [a, b, scale, shift]
    if residual is not None:
        in_specs.append(pl.BlockSpec((tm, tn), lambda i, j: (i, j)))
        args.append(residual)
    flops = 2 * mp * k * n
    bytes_accessed = sum(int(np.prod(x.shape)) * x.dtype.itemsize
                         for x in args) + mp * n * 2
    out = pl.pallas_call(
        functools.partial(_mm_bn_kernel, apply_relu=relu,
                          has_residual=residual is not None),
        out_shape=jax.ShapeDtypeStruct((mp, n), jnp.bfloat16),
        grid=(mp // tm, n // tn),
        in_specs=in_specs,
        out_specs=pl.BlockSpec((tm, tn), lambda i, j: (i, j)),
        compiler_params=pltpu.CompilerParams(
            dimension_semantics=("parallel", "parallel"),
            vmem_limit_bytes=_CFG["vmem_limit"]),
        cost_estimate=pl.CostEstimate(flops=flops, transcendentals=0,
                                      bytes_accessed=bytes_accessed),
    )(*args)
    return out[:m] if mp != m else out


def _grouped_mm_bn_kernel(a_ref, b_ref, sc_ref, sh_ref, o_ref, *, apply_relu):
    """One packed block-diagonal chunk: (tm, 1152)bf16 @ (1152, 128)bf16 on the
    MXU (p = 128//npg groups at once), fused BN (+ReLU), bf16 128-lane store."""
    y = jnp.dot(a_ref[...], b_ref[...], preferred_element_type=jnp.float32)
    y = y * sc_ref[...] + sh_ref[...]
    if apply_relu:
        y = jnp.maximum(y, 0.0)
    o_ref[...] = y.astype(o_ref.dtype)


def grouped_matmul_bn(a, w2d, scale, shift, *, relu, chunk_k):
    """a: (M, num_chunks*chunk_k) bf16 im2col (channel-major, tap-minor),
    w2d: (num_chunks*chunk_k, 128) bf16 packed block-diagonal weight slabs,
    scale/shift: (1, num_chunks*128) f32  ->  (M, num_chunks*128) bf16."""
    m, ktot = a.shape
    n = scale.shape[1]
    num_chunks = n // _PACK_LANES
    assert ktot == num_chunks * chunk_k
    tm, mp = _choose_m_tiling(m, _CFG["g_tm"])
    if mp != m:
        a = jnp.pad(a, ((0, mp - m), (0, 0)))
    flops = 2 * mp * ktot * _PACK_LANES
    bytes_accessed = (int(np.prod(a.shape)) * a.dtype.itemsize
                      + int(np.prod(w2d.shape)) * w2d.dtype.itemsize
                      + mp * n * 2 + 2 * n * 4)
    out = pl.pallas_call(
        functools.partial(_grouped_mm_bn_kernel, apply_relu=relu),
        out_shape=jax.ShapeDtypeStruct((mp, n), jnp.bfloat16),
        grid=(mp // tm, num_chunks),
        in_specs=[
            pl.BlockSpec((tm, chunk_k), lambda i, c: (i, c)),
            pl.BlockSpec((chunk_k, _PACK_LANES), lambda i, c: (c, 0)),
            pl.BlockSpec((1, _PACK_LANES), lambda i, c: (0, c)),
            pl.BlockSpec((1, _PACK_LANES), lambda i, c: (0, c)),
        ],
        out_specs=pl.BlockSpec((tm, _PACK_LANES), lambda i, c: (i, c)),
        compiler_params=pltpu.CompilerParams(
            dimension_semantics=("parallel", "parallel"),
            vmem_limit_bytes=_CFG["vmem_limit"]),
        cost_estimate=pl.CostEstimate(flops=flops, transcendentals=0,
                                      bytes_accessed=bytes_accessed),
    )(a, w2d, scale, shift)
    return out[:m] if mp != m else out


def _fc_relu_dropout_kernel(x_ref, w_ref, b_ref, m_ref, o_ref):
    y = jnp.dot(x_ref[...], w_ref[...], preferred_element_type=jnp.float32)
    y = jnp.maximum(y + b_ref[...], 0.0)          # Linear + ReLU
    o_ref[...] = y * m_ref[...]                   # Dropout via {0,2} scale mask


def fc_relu_dropout(x, w, b, drop_scale):
    """x: (B, 2048) f32, w: (2048, 256) bf16, b: (1, 256) f32,
    drop_scale: (B, 256) f32 in {0, 2}  ->  (B, 256) f32."""
    return pl.pallas_call(
        _fc_relu_dropout_kernel,
        out_shape=jax.ShapeDtypeStruct((x.shape[0], w.shape[1]), jnp.float32),
    )(x.astype(jnp.bfloat16), w, b, drop_scale)


# ----------------------------------------------------------------------------
# Glue: im2col (NHWC), conv wrapper, pooling
# ----------------------------------------------------------------------------
def _im2col_nhwc(x, k, stride, padding):
    """x: (N, H, W, C) -> (N, OH, OW, C*k*k); contraction index = c*k*k + i*k + j."""
    n, h, w, c = x.shape
    xp = jnp.pad(x, ((0, 0), (padding, padding), (padding, padding), (0, 0)))
    oh = (h + 2 * padding - k) // stride + 1
    ow = (w + 2 * padding - k) // stride + 1
    cols = []
    for i in range(k):
        for j in range(k):
            cols.append(xp[:, i:i + stride * oh:stride, j:j + stride * ow:stride, :])
    patches = jnp.stack(cols, axis=-1)                  # (N, OH, OW, C, k*k)
    return patches.reshape(n, oh, ow, c * k * k), oh, ow


def conv_bn(x, spatial, p, *, stride, padding, relu, residual=None):
    """Conv2d (no bias) + folded BatchNorm + optional residual add + ReLU.

    x: (N*H*W, Cin) bf16 channels-last flat activations, spatial=(N, H, W).
    Returns ((N*OH*OW, Cout) bf16, (N, OH, OW))."""
    n, h, w = spatial
    cin, k, g = p["cin"], p["k"], p["groups"]
    if k == 1:
        if stride != 1:
            x4 = x.reshape(n, h, w, cin)[:, ::stride, ::stride, :]
            oh, ow = x4.shape[1], x4.shape[2]
            a = x4.reshape(n * oh * ow, cin)
        else:
            oh, ow = h, w
            a = x
    else:
        x4 = x.reshape(n, h, w, cin)
        patches, oh, ow = _im2col_nhwc(x4, k, stride, padding)
        a = patches.reshape(n * oh * ow, cin * k * k)
    if g == 1:
        out = matmul_bn(a, p["w"], p["scale"], p["shift"], relu=relu,
                        residual=residual)
    else:
        assert residual is None
        # im2col layout (M, C*9) is already group-block contiguous; no pad/reshape.
        out = grouped_matmul_bn(a, p["w"], p["scale"], p["shift"], relu=relu,
                                chunk_k=p["chunk_k"])
    return out, (n, oh, ow)


def maxpool_3x3_s2_p1_nhwc(x):
    # TODO(synk): MaxPool2d kept as lax.reduce_window glue (not a Pallas hot path);
    # it now runs on bf16 activations.
    neg_inf = jnp.array(-jnp.inf, dtype=x.dtype)
    return jax.lax.reduce_window(
        x, neg_inf, jax.lax.max,
        window_dimensions=(1, 3, 3, 1),
        window_strides=(1, 2, 2, 1),
        padding=((0, 0), (1, 1), (1, 1), (0, 0)))


# ----------------------------------------------------------------------------
# Parameter construction (deterministic, synthetic — resnext101_32x8d shapes)
# ----------------------------------------------------------------------------
def _conv_bn_params(key, cin, cout, k, groups=1):
    cg = cin // groups
    npg = cout // groups
    fan_in = cg * k * k
    w = jax.random.normal(key, (cout, cg, k, k), jnp.float32)
    w = w * np.float32(math.sqrt(2.0 / fan_in))
    # BatchNorm defaults: gamma=1, beta=0, running_mean=0, running_var=1 (eval fold).
    gamma = jnp.ones((cout,), jnp.float32)
    beta = jnp.zeros((cout,), jnp.float32)
    mean = jnp.zeros((cout,), jnp.float32)
    var = jnp.ones((cout,), jnp.float32)
    scale = gamma / jnp.sqrt(var + _BN_EPS)
    shift = beta - mean * scale
    kg = cg * k * k
    prm = {"scale": scale.reshape(1, cout), "shift": shift.reshape(1, cout),
           "cin": cin, "cout": cout, "k": k, "groups": groups}
    if groups == 1:
        # GEMM-ready dense weight (K, Cout), K = Cin*k*k (no zero padding).
        prm["w"] = w.reshape(cout, kg).T.astype(jnp.bfloat16)
    else:
        # Pack p = 128 // npg groups into block-diagonal (p*kg, 128) slabs so
        # each grid step is one full-width MXU GEMM with 128 dense output lanes.
        p = _PACK_LANES // npg
        assert p * npg == _PACK_LANES and groups % p == 0
        num_chunks = groups // p
        wg = w.reshape(groups, npg, kg)              # per-group (npg, kg)
        wg = jnp.transpose(wg, (0, 2, 1))            # (G, kg, npg)
        wc = wg.reshape(num_chunks, p, kg, npg)
        eye = jnp.eye(p, dtype=w.dtype)
        slab = jnp.einsum('cgkn,gh->cgkhn', wc, eye)  # block diag per chunk
        slab = slab.reshape(num_chunks * p * kg, p * npg)
        prm["w"] = slab.astype(jnp.bfloat16)          # (chunks*1152, 128)
        prm["chunk_k"] = p * kg                       # = 1152 for all layers
    return prm


def make_params(key):
    groups, width_per_group, expansion = 32, 8, 4
    layers_cfg = [(64, 3, 1), (128, 4, 2), (256, 23, 2), (512, 3, 2)]
    keys = list(jax.random.split(key, 160))
    it = iter(keys)
    params = {"stem": _conv_bn_params(next(it), 3, 64, 7)}
    inplanes = 64
    all_layers = []
    for planes, nblocks, stride in layers_cfg:
        width = int(planes * (width_per_group / 64.0)) * groups
        layer = []
        for bi in range(nblocks):
            s = stride if bi == 0 else 1
            blk = {
                "stride": s,
                "conv1": _conv_bn_params(next(it), inplanes, width, 1),
                "conv2": _conv_bn_params(next(it), width, width, 3, groups),
                "conv3": _conv_bn_params(next(it), width, planes * expansion, 1),
            }
            if s != 1 or inplanes != planes * expansion:
                blk["down"] = _conv_bn_params(next(it), inplanes,
                                              planes * expansion, 1)
            layer.append(blk)
            inplanes = planes * expansion
        all_layers.append(layer)
    params["layers"] = all_layers
    kw, kb = jax.random.split(next(it))
    # Linear(2048 -> 256): stored as (in, out) = W^T in bf16 for the MXU.
    params["fc_w"] = (jax.random.normal(kw, (2048, 256), jnp.float32)
                      * np.float32(1.0 / math.sqrt(2048))).astype(jnp.bfloat16)
    params["fc_b"] = jax.random.normal(kb, (1, 256), jnp.float32) * 0.01
    return params


# ----------------------------------------------------------------------------
# Forward pass: Backbone(images) = dropout(relu(resnext101_32x8d(images)))
# ----------------------------------------------------------------------------
def backbone_forward(params, images, drop_scale):
    n, _, h, w = images.shape
    x4 = jnp.transpose(images, (0, 2, 3, 1)).astype(jnp.bfloat16)  # NCHW->NHWC once
    x = x4.reshape(n * h * w, 3)
    x, sp = conv_bn(x, (n, h, w), params["stem"], stride=2, padding=3, relu=True)
    nb, oh, ow = sp
    x4 = maxpool_3x3_s2_p1_nhwc(x.reshape(nb, oh, ow, 64))
    sp = (x4.shape[0], x4.shape[1], x4.shape[2])
    x = x4.reshape(sp[0] * sp[1] * sp[2], 64)
    for layer in params["layers"]:
        for blk in layer:
            s = blk["stride"]
            identity = x
            out, sp1 = conv_bn(x, sp, blk["conv1"], stride=1, padding=0, relu=True)
            out, sp2 = conv_bn(out, sp1, blk["conv2"], stride=s, padding=1,
                               relu=True)
            if "down" in blk:
                identity, _ = conv_bn(x, sp, blk["down"], stride=s, padding=0,
                                      relu=False)
            # Residual add + ReLU fused into the conv3 GEMM epilogue (bf16 out).
            x, sp = conv_bn(out, sp2, blk["conv3"], stride=1, padding=0,
                            relu=True, residual=identity)
    nb, oh, ow = sp
    c = x.shape[-1]
    pooled = jnp.mean(x.reshape(nb, oh, ow, c).astype(jnp.float32), axis=(1, 2))
    return fc_relu_dropout(pooled, params["fc_w"], params["fc_b"], drop_scale)


# ----------------------------------------------------------------------------
if __name__ == "__main__":
    key = jax.random.PRNGKey(0)
    pkey, xkey, dkey = jax.random.split(key, 3)
    params = make_params(pkey)
    images = jax.random.normal(xkey, (2, 3, 64, 64), jnp.float32)

    # Dropout(0.5) train-mode mask: keep w.p. 0.5, scale kept values by 2.
    # TODO(synk): mask drawn with jax.random, not PyTorch's dropout RNG stream.
    keep = jax.random.bernoulli(dkey, 0.5, (2, 256))
    drop_scale = keep.astype(jnp.float32) * 2.0

    feats = backbone_forward(params, images, drop_scale)
    feats = jax.block_until_ready(feats)

    assert feats.shape == (2, 256), feats.shape
    assert feats.dtype == jnp.float32
    assert bool(jnp.all(feats >= 0.0))           # ReLU + dropout => non-negative
    assert bool(jnp.all(jnp.isfinite(feats)))
    print("KERNEL_OK")
</pallas_src>

<mosaic_0001>
module attributes {stable_mosaic.version = 11 : i64} {
  func.func @_mm_bn_kernel(%arg0: i32, %arg1: i32, %arg2: memref<256x147xbf16, #tpu.memory_space<vmem>>, %arg3: memref<147x64xbf16, #tpu.memory_space<vmem>>, %arg4: memref<1x64xf32, #tpu.memory_space<vmem>>, %arg5: memref<1x64xf32, #tpu.memory_space<vmem>>, %arg6: memref<256x64xbf16, #tpu.memory_space<vmem>>) attributes {dimension_semantics = [#tpu.dimension_semantics<parallel>, #tpu.dimension_semantics<parallel>], iteration_bounds = array<i64: 8, 1>, scalar_prefetch = 0 : i64, scratch_operands = 0 : i64, tpu.core_type = #tpu.core_type<tc>, window_params = [{transform_indices = @transform_0, window_bounds = array<i64: 256, 147>}, {transform_indices = @transform_1, window_bounds = array<i64: 147, 64>}, {transform_indices = @transform_2, window_bounds = array<i64: 1, 64>}, {transform_indices = @transform_3, window_bounds = array<i64: 1, 64>}, {transform_indices = @transform_4, window_bounds = array<i64: 256, 64>}]} {
    %c0 = arith.constant 0 : index
    %c0_0 = arith.constant 0 : index
    %0 = vector.load %arg2[%c0, %c0_0] : memref<256x147xbf16, #tpu.memory_space<vmem>>, vector<256x147xbf16>
    %c0_1 = arith.constant 0 : index
    %c0_2 = arith.constant 0 : index
    %1 = vector.load %arg3[%c0_1, %c0_2] : memref<147x64xbf16, #tpu.memory_space<vmem>>, vector<147x64xbf16>
    %cst = arith.constant dense<0.000000e+00> : vector<256x64xf32>
    %2 = tpu.matmul %0, %1, %cst {dimension_numbers = #tpu.dot_dimension_numbers<[1], [0], [0], [1], [0, 0, 1, 1], [], []>} : vector<256x147xbf16>, vector<147x64xbf16>, vector<256x64xf32> -> vector<256x64xf32>
    %c0_3 = arith.constant 0 : index
    %c0_4 = arith.constant 0 : index
    %3 = vector.load %arg4[%c0_3, %c0_4] : memref<1x64xf32, #tpu.memory_space<vmem>>, vector<1x64xf32>
    %4 = vector.broadcast %3 : vector<1x64xf32> to vector<256x64xf32>
    %5 = arith.mulf %2, %4 : vector<256x64xf32>
    %c0_5 = arith.constant 0 : index
    %c0_6 = arith.constant 0 : index
    %6 = vector.load %arg5[%c0_5, %c0_6] : memref<1x64xf32, #tpu.memory_space<vmem>>, vector<1x64xf32>
    %7 = vector.broadcast %6 : vector<1x64xf32> to vector<256x64xf32>
    %8 = arith.addf %5, %7 : vector<256x64xf32>
    %cst_7 = arith.constant 0.000000e+00 : f32
    %9 = vector.broadcast %cst_7 : f32 to vector<256x64xf32>
    %10 = arith.maximumf %8, %9 : vector<256x64xf32>
    %11 = arith.truncf %10 : vector<256x64xf32> to vector<256x64xbf16>
    %c0_8 = arith.constant 0 : index
    %c0_9 = arith.constant 0 : index
    %12 = vector.load %arg6[%c0_8, %c0_9] : memref<256x64xbf16, #tpu.memory_space<vmem>>, vector<256x64xbf16>
    tpu.vector_store %arg6[%c0_8, %c0_9], %11 {strides = array<i32>} : memref<256x64xbf16, #tpu.memory_space<vmem>>, vector<256x64xbf16>,
    return
  }
  func.func @transform_0(%arg0: i32, %arg1: i32) -> (i32, i32) {
    %c0_i32 = arith.constant 0 : i32
    %c0_i32_0 = arith.constant 0 : i32
    return %arg0, %c0_i32 : i32, i32
  }
  func.func @transform_1(%arg0: i32, %arg1: i32) -> (i32, i32) {
    %c0_i32 = arith.constant 0 : i32
    %c0_i32_0 = arith.constant 0 : i32
    return %c0_i32, %arg1 : i32, i32
  }
  func.func @transform_2(%arg0: i32, %arg1: i32) -> (i32, i32) {
    %c0_i32 = arith.constant 0 : i32
    %c0_i32_0 = arith.constant 0 : i32
    return %c0_i32, %arg1 : i32, i32
  }
  func.func @transform_3(%arg0: i32, %arg1: i32) -> (i32, i32) {
    %c0_i32 = arith.constant 0 : i32
    %c0_i32_0 = arith.constant 0 : i32
    return %c0_i32, %arg1 : i32, i32
  }
  func.func @transform_4(%arg0: i32, %arg1: i32) -> (i32, i32) {
    %c0_i32 = arith.constant 0 : i32
    return %arg0, %arg1 : i32, i32
  }
}

</mosaic_0001>

<bundles_post_ra>
// kernel: tpu_custom_call.1
= control target key start
LH: loop header
LB: loop body
LE: loop exit
PB: predicated region body
PF: predicated region fallthrough
CT: control target
= control target key end

     0   :  { %s1419_s15 = smov 0   ;;  %s1421_s16 = smov 0   ;;  %s1676_s0 = inlined_call_operand.vmem [shape: bf16[2048,147], index: 0, kind: input, shape index: {}]   ;;  %s1677_s1 = inlined_call_operand.vmem [shape: bf16[147,64], index: 1, kind: input, shape index: {}]   ;;  %s1678_s2 = inlined_call_operand.vmem [shape: f32[1,64], index: 2, kind: input, shape index: {}]   ;;  %s1679_s3 = inlined_call_operand.vmem [shape: f32[1,64], index: 3, kind: input, shape index: {}]   ;;  %s1680_s4 = inlined_call_operand.vmem [shape: bf16[2048,64], index: 4, kind: output, shape index: {}]  }
   0x1   :  { %s1423_s17 = smov 0  }
   0x2 LB: > { %s26_s18 = sadd.s32 1, %s1386_s16  ;;  %p1131_p0 = scmp.ge.s32.totalorder %s1390_s17, 1  ;;  %s1390_s17 = sphi %s1423_s17, %s14_s17   ;;  %s1386_s16 = sphi %s1421_s16, %s1682_s16   ;;  %s1382_s15 = sphi %s1419_s15, %s1681_s15  }
   0x3   : > { %p28_p1 = scmp.ge.s32.totalorder %s26_s18, 8  ;;  %p203_p2 = scmp.lt.s32.totalorder %s1390_s17, 9 }
   0x5   : > { %s1684_s18 = smov (%p28_p1, %s26_s18), 0  ;;  %p204_p3 = pnand %p1131_p0, %p203_p2 }
   0x6   : > { %v1310_v0 = vld [vmem:[%s1677_s1] sm:$0xff] (!%p204_p3)   ;;  %v1392_v1 = vmov (!%p204_p3), 0   ;;  %v1311_v2 = vld [vmem:[%s1677_s1 + $0x8] sm:$0xff] (!%p204_p3)   ;;  %v1312_v3 = vld [vmem:[%s1677_s1 + $0x10] sm:$0xff] (!%p204_p3)   ;;  %s1132_s25 = sshll.u32 (!%p204_p3), %s1382_s15, 5  ;;  %vm522_vm0 = vcmask (!%p204_p3), 154624  }
   0x7   : > { %207 = sbr.rel (%p204_p3) target bundleno = 326 (0x146), region = 36  ;;  %578 = vmatprep.subr.bf16.mxu0 (!%p204_p3), %v1392_v1  ;;  %1264 = vmatprep.subr.bf16.mxu1 (!%p204_p3), %v1392_v1  ;;  %p244_p4 = scmp.lt.s32.totalorder (!%p204_p3), %s1132_s25, 255  ;;  %v1313_v4 = vld [vmem:[%s1677_s1 + $0x18] sm:$0xff] (!%p204_p3)   ;;  %v1314_v5 = vld [vmem:[%s1677_s1 + $0x20] sm:$0xff] (!%p204_p3)   ;;  %v1315_v8 = vld [vmem:[%s1677_s1 + $0x28] sm:$0xff] (!%p204_p3)   ;;  %vm571_vm1 = vcmask (!%p204_p3), 1040384  }
   0x8   : > { %579 = vmatpush1.bf16.msra.mxu0 (!%p204_p3), %v1310_v0  ;;  %1274 = vmatpush1.bf16.msra.mxu1 (!%p204_p3), %v1310_v0  ;;  %v1316_v9 = vld [vmem:[%s1677_s1 + $0x30] sm:$0xff] (!%p204_p3)   ;;  %v1317_v10 = vld [vmem:[%s1677_s1 + $0x38] sm:$0xff] (!%p204_p3)   ;;  %vm572_vm2 = vcmask (!%p204_p3), 1041408   ;;  %v1393_v11 = vmov (!%p204_p3), 65535   ;;  %v1318_v13 = vld [vmem:[%s1677_s1 + $0x40] sm:$0xff] (!%p204_p3)   ;;  %vm977_vm3 = vcmask (!%p204_p3), 519168  }
   0x9   : > { %580 = vmatprep.subr.bf16.mxu0 (!%p204_p3), %v1392_v1  ;;  %1265 = vmatprep.subr.bf16.mxu1 (!%p204_p3), %v1392_v1  ;;  %v573_v12 = vsel (!%p204_p3), %vm571_vm1, 4294967295, %v1393_v11  ;;  %v1319_v14 = vld [vmem:[%s1677_s1 + $0x48] ss:$0 sps:$4 sm:$0x33] (!%p204_p3)   ;;  %v1526_v47 = vld [vmem:[%s1678_s2] ss:$0 sm:$0xff] (!%p204_p3) }
   0xa   : > { %v574_v15 = vsel (!%p204_p3), %vm572_vm2, %v573_v12, 0  ;;  %v1531_v49 = vld [vmem:[%s1679_s3] ss:$0 sm:$0xff] (!%p204_p3) }
   0xb   : > { %v576_v16 = vand.u32 (!%p204_p3), %v1319_v14, %v574_v15 }
   0xc   : > { %581 = vmatpush1.bf16.msra.mxu0 (!%p204_p3), %v1311_v2  ;;  %1275 = vmatpush1.bf16.msra.mxu1 (!%p204_p3), %v1311_v2 }
   0xd   : > { %582 = vmatprep.subr.bf16.mxu0 (!%p204_p3), %v1392_v1  ;;  %1266 = vmatprep.subr.bf16.mxu1 (!%p204_p3), %v1392_v1 }
   0xe   : > { %s1686_s25 = smov (!%p244_p4, %s1132_s25), 255 }
   0xf   : > { %s1231_s28 = sshll.u32 %s1686_s25, 3  ;;  %s1136_s26 = sshll.u32 %s1686_s25, 2 }
  0x10   : > { %583 = vmatpush1.bf16.msra.mxu0 %v1312_v3  ;;  %1276 = vmatpush1.bf16.msra.mxu1 %v1312_v3  ;;  %s1455_s5 = scalar_lea.vmem %s1676_s0, %s1231_s28  ;;  %s1545_s25 = scalar_lea.vmem %s1680_s4, %s1136_s26 }
  0x11   : > { %584 = vmatprep.subr.bf16.mxu0 %v1392_v1  ;;  %1267 = vmatprep.subr.bf16.mxu1 %v1392_v1  ;;  %v1322_v6 = vld [vmem:[%s1455_s5 + $0x4] ss:$8 sps:$4 sm:$0xff]   ;;  %v1320_v17 = vld [vmem:[%s1455_s5] ss:$8 sps:$4 sm:$0xff]   ;;  %v1326_v19 = vld [vmem:[%s1455_s5 + $0x14] ss:$8 sps:$4 sm:$0xff]  }
  0x12   : > { %v1325_v7 = vld [vmem:[%s1455_s5 + $0x84] ss:$8 sps:$4 sm:$0xff]   ;;  %1179 = vmatprep.mubr.msk.bf16.mxu0 %vm522_vm0, %v1322_v6  ;;  %v1323_v18 = vld [vmem:[%s1455_s5 + $0x80] ss:$8 sps:$4 sm:$0xff]   ;;  %v1328_v20 = vld [vmem:[%s1455_s5 + $0x94] ss:$8 sps:$4 sm:$0xff]  }
  0x13   : > { %1187 = vmatprep.mubr.msk.bf16.mxu1 %vm522_vm0, %v1325_v7  ;;  %v1330_v21 = vld [vmem:[%s1455_s5 + $0x10] ss:$8 sps:$4 sm:$0xff]   ;;  %v1332_v23 = vld [vmem:[%s1455_s5 + $0x24] ss:$8 sps:$4 sm:$0xff]   ;;  %v1336_v25 = vld [vmem:[%s1455_s5 + $0x20] ss:$8 sps:$4 sm:$0xff]  }
  0x14   : > { %585 = vmatpush1.bf16.msra.mxu0 %v1313_v4  ;;  %1277 = vmatpush1.bf16.msra.mxu1 %v1313_v4  ;;  %v1331_v22 = vld [vmem:[%s1455_s5 + $0x90] ss:$8 sps:$4 sm:$0xff]   ;;  %v1334_v24 = vld [vmem:[%s1455_s5 + $0xa4] ss:$8 sps:$4 sm:$0xff]   ;;  %v1337_v26 = vld [vmem:[%s1455_s5 + $0xa0] ss:$8 sps:$4 sm:$0xff]  }
  0x15   : > { %586 = vmatprep.subr.bf16.mxu0 %v1392_v1  ;;  %1268 = vmatprep.subr.bf16.mxu1 %v1392_v1  ;;  %v1338_v27 = vld [vmem:[%s1455_s5 + $0x34] ss:$8 sps:$4 sm:$0xff]   ;;  %v1342_v29 = vld [vmem:[%s1455_s5 + $0x30] ss:$8 sps:$4 sm:$0xff]   ;;  %v1344_v31 = vld [vmem:[%s1455_s5 + $0x44] ss:$8 sps:$4 sm:$0xff]  }
  0x16   : > { %v1340_v28 = vld [vmem:[%s1455_s5 + $0xb4] ss:$8 sps:$4 sm:$0xff]   ;;  %v1343_v30 = vld [vmem:[%s1455_s5 + $0xb0] ss:$8 sps:$4 sm:$0xff]   ;;  %v1346_v32 = vld [vmem:[%s1455_s5 + $0xc4] ss:$8 sps:$4 sm:$0xff]  }
  0x17   : > { %v1348_v33 = vld [vmem:[%s1455_s5 + $0x40] ss:$8 sps:$4 sm:$0xff]   ;;  %v1350_v35 = vld [vmem:[%s1455_s5 + $0x54] ss:$8 sps:$4 sm:$0xff]   ;;  %v1354_v37 = vld [vmem:[%s1455_s5 + $0x50] ss:$8 sps:$4 sm:$0xff]  }
  0x18   : > { %587 = vmatpush1.bf16.msra.mxu0 %v1314_v5  ;;  %1278 = vmatpush1.bf16.msra.mxu1 %v1314_v5  ;;  %v1349_v34 = vld [vmem:[%s1455_s5 + $0xc0] ss:$8 sps:$4 sm:$0xff]   ;;  %v1352_v36 = vld [vmem:[%s1455_s5 + $0xd4] ss:$8 sps:$4 sm:$0xff]   ;;  %v1355_v38 = vld [vmem:[%s1455_s5 + $0xd0] ss:$8 sps:$4 sm:$0xff]  }
  0x19   : > { %588 = vmatprep.subr.bf16.mxu0 %v1392_v1  ;;  %1269 = vmatprep.subr.bf16.mxu1 %v1392_v1  ;;  %v1356_v39 = vld [vmem:[%s1455_s5 + $0x64] ss:$8 sps:$4 sm:$0xff]   ;;  %v1360_v41 = vld [vmem:[%s1455_s5 + $0x60] ss:$8 sps:$4 sm:$0xff]   ;;  %v1362_v43 = vld [vmem:[%s1455_s5 + $0x74] ss:$8 sps:$4 sm:$0xff]  }
  0x1a   : > { %v1358_v40 = vld [vmem:[%s1455_s5 + $0xe4] ss:$8 sps:$4 sm:$0xff]   ;;  %v1361_v42 = vld [vmem:[%s1455_s5 + $0xe0] ss:$8 sps:$4 sm:$0xff]   ;;  %v1364_v44 = vld [vmem:[%s1455_s5 + $0xf4] ss:$8 sps:$4 sm:$0xff]  }
  0x1b   : > { %v1366_v45 = vld [vmem:[%s1455_s5 + $0x70] ss:$8 sps:$4 sm:$0xff]  }
  0x1c   : > { %589 = vmatpush1.bf16.msra.mxu0 %v1315_v8  ;;  %1279 = vmatpush1.bf16.msra.mxu1 %v1315_v8  ;;  %v1367_v46 = vld [vmem:[%s1455_s5 + $0xf0] ss:$8 sps:$4 sm:$0xff]  }
  0x1d   : > { %590 = vmatprep.subr.bf16.mxu0 %v1392_v1  ;;  %1270 = vmatprep.subr.bf16.mxu1 %v1392_v1 }
  0x20   : > { %591 = vmatpush1.bf16.msra.mxu0 %v1316_v9  ;;  %1280 = vmatpush1.bf16.msra.mxu1 %v1316_v9 }
  0x21   : > { %592 = vmatprep.subr.bf16.mxu0 %v1392_v1  ;;  %1271 = vmatprep.subr.bf16.mxu1 %v1392_v1 }
  0x24   : > { %593 = vmatpush1.bf16.msra.mxu0 %v1317_v10  ;;  %1281 = vmatpush1.bf16.msra.mxu1 %v1317_v10 }
  0x25   : > { %594 = vmatprep.subr.bf16.mxu0 %v1392_v1  ;;  %1272 = vmatprep.subr.bf16.mxu1 %v1392_v1 }
  0x28   : > { %595 = vmatpush1.bf16.msra.mxu0 %v1318_v13  ;;  %1282 = vmatpush1.bf16.msra.mxu1 %v1318_v13 }
  0x29   : > { %596 = vmatprep.subr.bf16.mxu0 %v1392_v1  ;;  %1273 = vmatprep.subr.bf16.mxu1 %v1392_v1 }
  0x2c   : > { %597 = vmatpush1.bf16.msra.mxu0 %v576_v16  ;;  %1283 = vmatpush1.bf16.msra.mxu1 %v576_v16 }
  0x2f   : > { %611 = vmatmul.mubr.bf16.vlgmr.msra.gmra.mrb[0].mxu0 %v1320_v17  ;;  %675 = vmatmul.mubr.bf16.vlgmr.msra.gmra.mrb[0].mxu1 %v1323_v18 }
  0x30   : > { %1180 = vmatprep.mubr.msk.bf16.mxu0 %vm522_vm0, %v1326_v19  ;;  %1188 = vmatprep.mubr.msk.bf16.mxu1 %vm522_vm0, %v1328_v20 }
  0x37   : > { %619 = vmatmul.mubr.bf16.gmra.mrb[4].mxu0 %v1330_v21  ;;  %683 = vmatmul.mubr.bf16.gmra.mrb[4].mxu1 %v1331_v22 }
  0x38   : > { %1181 = vmatprep.mubr.msk.bf16.mxu0 %vm522_vm0, %v1332_v23  ;;  %1189 = vmatprep.mubr.msk.bf16.mxu1 %vm522_vm0, %v1334_v24 }
  0x3f   : > { %627 = vmatmul.mubr.bf16.gmra.mrb[8].mxu0 %v1336_v25  ;;  %691 = vmatmul.mubr.bf16.gmra.mrb[8].mxu1 %v1337_v26 }
  0x40   : > { %1182 = vmatprep.mubr.msk.bf16.mxu0 %vm522_vm0, %v1338_v27  ;;  %1190 = vmatprep.mubr.msk.bf16.mxu1 %vm522_vm0, %v1340_v28 }
  0x47   : > { %635 = vmatmul.mubr.bf16.gmra.mrb[12].mxu0 %v1342_v29  ;;  %699 = vmatmul.mubr.bf16.gmra.mrb[12].mxu1 %v1343_v30 }
  0x48   : > { %1183 = vmatprep.mubr.msk.bf16.mxu0 %vm522_vm0, %v1344_v31  ;;  %1191 = vmatprep.mubr.msk.bf16.mxu1 %vm522_vm0, %v1346_v32 }
  0x4f   : > { %643 = vmatmul.mubr.bf16.gmra.mrb[16].mxu0 %v1348_v33  ;;  %707 = vmatmul.mubr.bf16.gmra.mrb[16].mxu1 %v1349_v34 }
  0x50   : > { %1184 = vmatprep.mubr.msk.bf16.mxu0 %vm522_vm0, %v1350_v35  ;;  %1192 = vmatprep.mubr.msk.bf16.mxu1 %vm522_vm0, %v1352_v36 }
  0x57   : > { %651 = vmatmul.mubr.bf16.gmra.mrb[20].mxu0 %v1354_v37  ;;  %715 = vmatmul.mubr.bf16.gmra.mrb[20].mxu1 %v1355_v38 }
  0x58   : > { %1185 = vmatprep.mubr.msk.bf16.mxu0 %vm522_vm0, %v1356_v39  ;;  %1193 = vmatprep.mubr.msk.bf16.mxu1 %vm522_vm0, %v1358_v40 }
  0x5f   : > { %659 = vmatmul.mubr.bf16.gmra.mrb[24].mxu0 %v1360_v41  ;;  %723 = vmatmul.mubr.bf16.gmra.mrb[24].mxu1 %v1361_v42 }
  0x60   : > { %1186 = vmatprep.mubr.msk.bf16.mxu0 %vm522_vm0, %v1362_v43  ;;  %1194 = vmatprep.mubr.msk.bf16.mxu1 %vm522_vm0, %v1364_v44 }
  0x67   : > { %667 = vmatmul.mubr.bf16.gmra.mrb[28].mxu0 %v1366_v45  ;;  %731 = vmatmul.mubr.bf16.gmra.mrb[28].mxu1 %v1367_v46 }
 0x102   : > { %v612_v48 = vpop.f32.mrb[0].mxu0  ;;  %v676_v50 = vpop.f32.mrb[0].mxu1 }
 0x103   : > { %v746_v51 = vmul.f32 %v1526_v47, %v612_v48  ;;  %v762_v52 = vmul.f32 %v1526_v47, %v676_v50  ;;  %v614_v53 = vpop.f32.mrb[1].mxu0  ;;  %v678_v54 = vpop.f32.mrb[1].mxu1 }
 0x104   : > { %v615_v55 = vpop.f32.mrb[2].mxu0  ;;  %v679_v56 = vpop.f32.mrb[2].mxu1 }
 0x105   : > { %v785_v57 = vadd.f32 %v1531_v49, %v746_v51  ;;  %v801_v58 = vadd.f32 %v1531_v49, %v762_v52  ;;  %v747_v59 = vmul.f32 %v1526_v47, %v615_v55  ;;  %v763_v60 = vmul.f32 %v1526_v47, %v679_v56  ;;  %v617_v61 = vpop.f32.mrb[3].mxu0  ;;  %v681_v62 = vpop.f32.mrb[3].mxu1 }
 0x107   : > { %v817_v63 = vmax.f32 %v785_v57, 0.0  ;;  %v833_v0 = vmax.f32 %v801_v58, 0.0  ;;  %v786_v1 = vadd.f32 %v1531_v49, %v747_v59  ;;  %v802_v2 = vadd.f32 %v1531_v49, %v763_v60 }
 0x109   : > { %v1232_v3 = vpack.c.bf16 %v817_v63, %v817_v63  ;;  %v1248_v4 = vpack.c.bf16 %v833_v0, %v833_v0  ;;  %v818_v5 = vmax.f32 %v786_v1, 0.0  ;;  %v834_v6 = vmax.f32 %v802_v2, 0.0 }
 0x10a   : > { %v620_v7 = vpop.f32.mrb[4].mxu0  ;;  %v684_v8 = vpop.f32.mrb[4].mxu1 }
 0x10b   : > { %978 = vst.msk [vmem:[%s1545_s25] sm:$0xf] %vm977_vm3, %v1232_v3  ;;  %994 = vst.msk [vmem:[%s1545_s25 + $0x40] sm:$0xf] %vm977_vm3, %v1248_v4  ;;  %v1233_v9 = vpack.c.bf16 %v818_v5, %v818_v5  ;;  %v1249_v10 = vpack.c.bf16 %v834_v6, %v834_v6  ;;  %v748_v11 = vmul.f32 %v1526_v47, %v620_v7  ;;  %v622_v13 = vpop.f32.mrb[5].mxu0  ;;  %v686_v14 = vpop.f32.mrb[5].mxu1 }
 0x10c   : > { %v764_v12 = vmul.f32 %v1526_v47, %v684_v8  ;;  %v623_v15 = vpop.f32.mrb[6].mxu0  ;;  %v687_v16 = vpop.f32.mrb[6].mxu1 }
 0x10d   : > { %979 = vst.msk [vmem:[%s1545_s25 + $0x4] sm:$0xf] %vm977_vm3, %v1233_v9  ;;  %995 = vst.msk [vmem:[%s1545_s25 + $0x44] sm:$0xf] %vm977_vm3, %v1249_v10  ;;  %v787_v17 = vadd.f32 %v1531_v49, %v748_v11  ;;  %v749_v19 = vmul.f32 %v1526_v47, %v623_v15  ;;  %v765_v20 = vmul.f32 %v1526_v47, %v687_v16  ;;  %v625_v21 = vpop.f32.mrb[7].mxu0  ;;  %v689_v22 = vpop.f32.mrb[7].mxu1 }
 0x10e   : > { %v803_v18 = vadd.f32 %v1531_v49, %v764_v12 }
 0x10f   : > { %v819_v23 = vmax.f32 %v787_v17, 0.0  ;;  %v788_v25 = vadd.f32 %v1531_v49, %v749_v19  ;;  %v804_v26 = vadd.f32 %v1531_v49, %v765_v20 }
 0x110   : > { %v835_v24 = vmax.f32 %v803_v18, 0.0 }
 0x111   : > { %v1234_v27 = vpack.c.bf16 %v819_v23, %v819_v23  ;;  %v820_v29 = vmax.f32 %v788_v25, 0.0  ;;  %v836_v30 = vmax.f32 %v804_v26, 0.0 }
 0x112   : > { %v1250_v28 = vpack.c.bf16 %v835_v24, %v835_v24  ;;  %v628_v31 = vpop.f32.mrb[8].mxu0  ;;  %v692_v32 = vpop.f32.mrb[8].mxu1 }
 0x113   : > { %980 = vst.msk [vmem:[%s1545_s25 + $0x8] sm:$0xf] %vm977_vm3, %v1234_v27  ;;  %v1235_v33 = vpack.c.bf16 %v820_v29, %v820_v29  ;;  %v1251_v34 = vpack.c.bf16 %v836_v30, %v836_v30  ;;  %v750_v35 = vmul.f32 %v1526_v47, %v628_v31  ;;  %v766_v36 = vmul.f32 %v1526_v47, %v692_v32  ;;  %v630_v37 = vpop.f32.mrb[9].mxu0  ;;  %v694_v38 = vpop.f32.mrb[9].mxu1 }
 0x114   : > { %996 = vst.msk [vmem:[%s1545_s25 + $0x48] sm:$0xf] %vm977_vm3, %v1250_v28  ;;  %v631_v39 = vpop.f32.mrb[10].mxu0  ;;  %v695_v40 = vpop.f32.mrb[10].mxu1 }
 0x115   : > { %981 = vst.msk [vmem:[%s1545_s25 + $0xc] sm:$0xf] %vm977_vm3, %v1235_v33  ;;  %997 = vst.msk [vmem:[%s1545_s25 + $0x4c] sm:$0xf] %vm977_vm3, %v1251_v34  ;;  %v789_v41 = vadd.f32 %v1531_v49, %v750_v35  ;;  %v805_v42 = vadd.f32 %v1531_v49, %v766_v36  ;;  %v751_v43 = vmul.f32 %v1526_v47, %v631_v39  ;;  %v633_v45 = vpop.f32.mrb[11].mxu0  ;;  %v697_v46 = vpop.f32.mrb[11].mxu1 }
 0x116   : > { %v767_v44 = vmul.f32 %v1526_v47, %v695_v40 }
 0x117   : > { %v821_v48 = vmax.f32 %v789_v41, 0.0  ;;  %v837_v50 = vmax.f32 %v805_v42, 0.0  ;;  %v790_v51 = vadd.f32 %v1531_v49, %v751_v43 }
 0x118   : > { %v806_v52 = vadd.f32 %v1531_v49, %v767_v44 }
 0x119   : > { %v1236_v53 = vpack.c.bf16 %v821_v48, %v821_v48  ;;  %v1252_v54 = vpack.c.bf16 %v837_v50, %v837_v50  ;;  %v822_v55 = vmax.f32 %v790_v51, 0.0 }
 0x11a   : > { %v838_v56 = vmax.f32 %v806_v52, 0.0  ;;  %v636_v57 = vpop.f32.mrb[12].mxu0  ;;  %v700_v58 = vpop.f32.mrb[12].mxu1 }
 0x11b   : > { %982 = vst.msk [vmem:[%s1545_s25 + $0x10] sm:$0xf] %vm977_vm3, %v1236_v53  ;;  %998 = vst.msk [vmem:[%s1545_s25 + $0x50] sm:$0xf] %vm977_vm3, %v1252_v54  ;;  %v1237_v59 = vpack.c.bf16 %v822_v55, %v822_v55  ;;  %v752_v61 = vmul.f32 %v1526_v47, %v636_v57  ;;  %v768_v62 = vmul.f32 %v1526_v47, %v700_v58  ;;  %v638_v63 = vpop.f32.mrb[13].mxu0  ;;  %v702_v0 = vpop.f32.mrb[13].mxu1 }
 0x11c   : > { %v1253_v60 = vpack.c.bf16 %v838_v56, %v838_v56  ;;  %v639_v1 = vpop.f32.mrb[14].mxu0  ;;  %v703_v2 = vpop.f32.mrb[14].mxu1 }
 0x11d   : > { %983 = vst.msk [vmem:[%s1545_s25 + $0x14] sm:$0xf] %vm977_vm3, %v1237_v59  ;;  %v791_v3 = vadd.f32 %v1531_v49, %v752_v61  ;;  %v807_v4 = vadd.f32 %v1531_v49, %v768_v62  ;;  %v753_v5 = vmul.f32 %v1526_v47, %v639_v1  ;;  %v769_v6 = vmul.f32 %v1526_v47, %v703_v2  ;;  %v641_v7 = vpop.f32.mrb[15].mxu0  ;;  %v705_v8 = vpop.f32.mrb[15].mxu1 }
 0x11e   : > { %999 = vst.msk [vmem:[%s1545_s25 + $0x54] sm:$0xf] %vm977_vm3, %v1253_v60 }
 0x11f   : > { %v823_v9 = vmax.f32 %v791_v3, 0.0  ;;  %v839_v10 = vmax.f32 %v807_v4, 0.0  ;;  %v792_v11 = vadd.f32 %v1531_v49, %v753_v5  ;;  %v808_v12 = vadd.f32 %v1531_v49, %v769_v6 }
 0x121   : > { %v1238_v13 = vpack.c.bf16 %v823_v9, %v823_v9  ;;  %v1254_v14 = vpack.c.bf16 %v839_v10, %v839_v10  ;;  %v824_v15 = vmax.f32 %v792_v11, 0.0  ;;  %v840_v16 = vmax.f32 %v808_v12, 0.0 }
 0x122   : > { %v644_v17 = vpop.f32.mrb[16].mxu0  ;;  %v708_v18 = vpop.f32.mrb[16].mxu1 }
 0x123   : > { %984 = vst.msk [vmem:[%s1545_s25 + $0x18] sm:$0xf] %vm977_vm3, %v1238_v13  ;;  %1000 = vst.msk [vmem:[%s1545_s25 + $0x58] sm:$0xf] %vm977_vm3, %v1254_v14  ;;  %v1239_v19 = vpack.c.bf16 %v824_v15, %v824_v15  ;;  %v1255_v20 = vpack.c.bf16 %v840_v16, %v840_v16  ;;  %v754_v21 = vmul.f32 %v1526_v47, %v644_v17  ;;  %v646_v23 = vpop.f32.mrb[17].mxu0  ;;  %v710_v24 = vpop.f32.mrb[17].mxu1 }
 0x124   : > { %v770_v22 = vmul.f32 %v1526_v47, %v708_v18  ;;  %v647_v25 = vpop.f32.mrb[18].mxu0  ;;  %v711_v26 = vpop.f32.mrb[18].mxu1 }
 0x125   : > { %985 = vst.msk [vmem:[%s1545_s25 + $0x1c] sm:$0xf] %vm977_vm3, %v1239_v19  ;;  %1001 = vst.msk [vmem:[%s1545_s25 + $0x5c] sm:$0xf] %vm977_vm3, %v1255_v20  ;;  %v793_v27 = vadd.f32 %v1531_v49, %v754_v21  ;;  %v755_v29 = vmul.f32 %v1526_v47, %v647_v25  ;;  %v771_v30 = vmul.f32 %v1526_v47, %v711_v26  ;;  %v649_v31 = vpop.f32.mrb[19].mxu0  ;;  %v713_v32 = vpop.f32.mrb[19].mxu1 }
 0x126   : > { %v809_v28 = vadd.f32 %v1531_v49, %v770_v22 }
 0x127   : > { %v825_v33 = vmax.f32 %v793_v27, 0.0  ;;  %v794_v35 = vadd.f32 %v1531_v49, %v755_v29  ;;  %v810_v36 = vadd.f32 %v1531_v49, %v771_v30 }
 0x128   : > { %v841_v34 = vmax.f32 %v809_v28, 0.0 }
 0x129   : > { %v1240_v37 = vpack.c.bf16 %v825_v33, %v825_v33  ;;  %v826_v39 = vmax.f32 %v794_v35, 0.0  ;;  %v842_v40 = vmax.f32 %v810_v36, 0.0 }
 0x12a   : > { %v1256_v38 = vpack.c.bf16 %v841_v34, %v841_v34  ;;  %v652_v41 = vpop.f32.mrb[20].mxu0  ;;  %v716_v42 = vpop.f32.mrb[20].mxu1 }
 0x12b   : > { %986 = vst.msk [vmem:[%s1545_s25 + $0x20] sm:$0xf] %vm977_vm3, %v1240_v37  ;;  %v1241_v43 = vpack.c.bf16 %v826_v39, %v826_v39  ;;  %v1257_v44 = vpack.c.bf16 %v842_v40, %v842_v40  ;;  %v756_v45 = vmul.f32 %v1526_v47, %v652_v41  ;;  %v772_v46 = vmul.f32 %v1526_v47, %v716_v42  ;;  %v654_v48 = vpop.f32.mrb[21].mxu0  ;;  %v718_v50 = vpop.f32.mrb[21].mxu1 }
 0x12c   : > { %1002 = vst.msk [vmem:[%s1545_s25 + $0x60] sm:$0xf] %vm977_vm3, %v1256_v38  ;;  %v655_v51 = vpop.f32.mrb[22].mxu0  ;;  %v719_v52 = vpop.f32.mrb[22].mxu1 }
 0x12d   : > { %987 = vst.msk [vmem:[%s1545_s25 + $0x24] sm:$0xf] %vm977_vm3, %v1241_v43  ;;  %1003 = vst.msk [vmem:[%s1545_s25 + $0x64] sm:$0xf] %vm977_vm3, %v1257_v44  ;;  %v795_v53 = vadd.f32 %v1531_v49, %v756_v45  ;;  %v811_v54 = vadd.f32 %v1531_v49, %v772_v46  ;;  %v757_v55 = vmul.f32 %v1526_v47, %v655_v51  ;;  %v657_v57 = vpop.f32.mrb[23].mxu0  ;;  %v721_v58 = vpop.f32.mrb[23].mxu1 }
 0x12e   : > { %v773_v56 = vmul.f32 %v1526_v47, %v719_v52 }
 0x12f   : > { %v827_v59 = vmax.f32 %v795_v53, 0.0  ;;  %v843_v60 = vmax.f32 %v811_v54, 0.0  ;;  %v796_v61 = vadd.f32 %v1531_v49, %v757_v55 }
 0x130   : > { %v812_v62 = vadd.f32 %v1531_v49, %v773_v56 }
 0x131   : > { %v1242_v63 = vpack.c.bf16 %v827_v59, %v827_v59  ;;  %v1258_v0 = vpack.c.bf16 %v843_v60, %v843_v60  ;;  %v828_v1 = vmax.f32 %v796_v61, 0.0 }
 0x132   : > { %v844_v2 = vmax.f32 %v812_v62, 0.0  ;;  %v660_v3 = vpop.f32.mrb[24].mxu0  ;;  %v724_v4 = vpop.f32.mrb[24].mxu1 }
 0x133   : > { %988 = vst.msk [vmem:[%s1545_s25 + $0x28] sm:$0xf] %vm977_vm3, %v1242_v63  ;;  %1004 = vst.msk [vmem:[%s1545_s25 + $0x68] sm:$0xf] %vm977_vm3, %v1258_v0  ;;  %v1243_v5 = vpack.c.bf16 %v828_v1, %v828_v1  ;;  %v758_v7 = vmul.f32 %v1526_v47, %v660_v3  ;;  %v774_v8 = vmul.f32 %v1526_v47, %v724_v4  ;;  %v662_v9 = vpop.f32.mrb[25].mxu0  ;;  %v726_v10 = vpop.f32.mrb[25].mxu1 }
 0x134   : > { %v1259_v6 = vpack.c.bf16 %v844_v2, %v844_v2  ;;  %v663_v11 = vpop.f32.mrb[26].mxu0  ;;  %v727_v12 = vpop.f32.mrb[26].mxu1 }
 0x135   : > { %989 = vst.msk [vmem:[%s1545_s25 + $0x2c] sm:$0xf] %vm977_vm3, %v1243_v5  ;;  %v797_v13 = vadd.f32 %v1531_v49, %v758_v7  ;;  %v813_v14 = vadd.f32 %v1531_v49, %v774_v8  ;;  %v759_v15 = vmul.f32 %v1526_v47, %v663_v11  ;;  %v775_v16 = vmul.f32 %v1526_v47, %v727_v12  ;;  %v665_v17 = vpop.f32.mrb[27].mxu0  ;;  %v729_v18 = vpop.f32.mrb[27].mxu1 }
 0x136   : > { %1005 = vst.msk [vmem:[%s1545_s25 + $0x6c] sm:$0xf] %vm977_vm3, %v1259_v6 }
 0x137   : > { %v829_v19 = vmax.f32 %v797_v13, 0.0  ;;  %v845_v20 = vmax.f32 %v813_v14, 0.0  ;;  %v798_v21 = vadd.f32 %v1531_v49, %v759_v15  ;;  %v814_v22 = vadd.f32 %v1531_v49, %v775_v16 }
 0x139   : > { %v1244_v23 = vpack.c.bf16 %v829_v19, %v829_v19  ;;  %v1260_v24 = vpack.c.bf16 %v845_v20, %v845_v20  ;;  %v830_v25 = vmax.f32 %v798_v21, 0.0  ;;  %v846_v26 = vmax.f32 %v814_v22, 0.0 }
 0x13a   : > { %v668_v27 = vpop.f32.mrb[28].mxu0  ;;  %v732_v28 = vpop.f32.mrb[28].mxu1 }
 0x13b   : > { %990 = vst.msk [vmem:[%s1545_s25 + $0x30] sm:$0xf] %vm977_vm3, %v1244_v23  ;;  %1006 = vst.msk [vmem:[%s1545_s25 + $0x70] sm:$0xf] %vm977_vm3, %v1260_v24  ;;  %v1245_v29 = vpack.c.bf16 %v830_v25, %v830_v25  ;;  %v1261_v30 = vpack.c.bf16 %v846_v26, %v846_v26  ;;  %v760_v31 = vmul.f32 %v1526_v47, %v668_v27  ;;  %v670_v33 = vpop.f32.mrb[29].mxu0  ;;  %v734_v34 = vpop.f32.mrb[29].mxu1 }
 0x13c   : > { %v776_v32 = vmul.f32 %v1526_v47, %v732_v28  ;;  %v671_v35 = vpop.f32.mrb[30].mxu0  ;;  %v735_v36 = vpop.f32.mrb[30].mxu1 }
 0x13d   : > { %991 = vst.msk [vmem:[%s1545_s25 + $0x34] sm:$0xf] %vm977_vm3, %v1245_v29  ;;  %1007 = vst.msk [vmem:[%s1545_s25 + $0x74] sm:$0xf] %vm977_vm3, %v1261_v30  ;;  %v799_v37 = vadd.f32 %v1531_v49, %v760_v31  ;;  %v761_v39 = vmul.f32 %v1526_v47, %v671_v35  ;;  %v777_v40 = vmul.f32 %v1526_v47, %v735_v36  ;;  %v673_v41 = vpop.f32.mrb[31].mxu0  ;;  %v737_v42 = vpop.f32.mrb[31].mxu1 }
 0x13e   : > { %v815_v38 = vadd.f32 %v1531_v49, %v776_v32 }
 0x13f   : > { %v831_v43 = vmax.f32 %v799_v37, 0.0  ;;  %v800_v45 = vadd.f32 %v1531_v49, %v761_v39  ;;  %v816_v46 = vadd.f32 %v1531_v49, %v777_v40 }
 0x140   : > { %v847_v44 = vmax.f32 %v815_v38, 0.0 }
 0x141   : > { %v1246_v48 = vpack.c.bf16 %v831_v43, %v831_v43  ;;  %v832_v51 = vmax.f32 %v800_v45, 0.0  ;;  %v848_v52 = vmax.f32 %v816_v46, 0.0 }
 0x142   : > { %v1262_v50 = vpack.c.bf16 %v847_v44, %v847_v44 }
 0x143   : > { %992 = vst.msk [vmem:[%s1545_s25 + $0x38] sm:$0xf] %vm977_vm3, %v1246_v48  ;;  %v1247_v53 = vpack.c.bf16 %v832_v51, %v832_v51  ;;  %v1263_v54 = vpack.c.bf16 %v848_v52, %v848_v52 }
 0x144   : > { %1008 = vst.msk [vmem:[%s1545_s25 + $0x78] sm:$0xf] %vm977_vm3, %v1262_v50 }
 0x145   : > { %993 = vst.msk [vmem:[%s1545_s25 + $0x3c] sm:$0xf] %vm977_vm3, %v1247_v53  ;;  %1009 = vst.msk [vmem:[%s1545_s25 + $0x7c] sm:$0xf] %vm977_vm3, %v1263_v54 }
 0x146 PF: > { %s14_s17 = sadd.s32 1, %s1390_s17   ;;  %s1681_s15 = smov %s1386_s16 }
 0x147   : > { %p11_p5 = scmp.ge.s32.totalorder %s14_s17, 10   ;;  %s1682_s16 = smov %s1684_s18 }
 0x149   :  { %13 = sbr.rel (!%p11_p5) target bundleno = 2 (0x2), region = 75 }

</bundles_post_ra>
